<compile_context>
chip_gen: v6e
topology: v6e:2x2x1
jax: 0.10.0
libtpu: 0.0.40
codegen_flags: <defaults>
</compile_context>

<pallas_src>
import jax
import jax.numpy as jnp
from jax.experimental import pallas as pl
from jax.experimental.pallas import tpu as pltpu


def ffn_kernel(x_ref, w1_ref, b1_ref, w2_ref, b2_ref, o_ref):
    # dense1 + ReLU + dense2.  MXU matmuls accumulate in f32; bias/ReLU in f32.
    # Cast x to the weight dtype *inside* the kernel so a bf16 compute path does
    # not require an extra HBM copy of x in the wrapper.
    x = x_ref[...].astype(w1_ref.dtype)
    h = jnp.dot(x, w1_ref[...], preferred_element_type=jnp.float32)
    h = jnp.maximum(h + b1_ref[...], 0.0)
    y = jnp.dot(h.astype(w2_ref.dtype), w2_ref[...],
                preferred_element_type=jnp.float32)
    o_ref[...] = (y + b2_ref[...]).astype(o_ref.dtype)


def _round_up(x, m):
    return ((x + m - 1) // m) * m


def _block_diag(w, p):
    """kron(I_p, w): p copies of w on the diagonal (identity on packed rows)."""
    if p == 1:
        return w
    return jnp.kron(jnp.eye(p, dtype=w.dtype), w)


def _vmem_cap_bytes():
    """Generation-aware cap for vmem_limit_bytes (headroom for Mosaic scratch)."""
    try:
        info = pltpu.get_tpu_info()
        phys = int(getattr(info, "vmem_capacity_bytes", 0))
        if phys > 0:
            return phys * 3 // 4          # ~48 MiB on v7x, ~96 MiB on v5e/v6e
    except Exception:
        pass
    return 48 * 1024 * 1024               # safe on v7x's 64 MiB per-TC VMEM


def position_wise_ffn(x, w1, b1, w2, b2, *, tm=8192, compute_dtype=None,
                      out_dtype=None):
    """x: (batch, seq, d_in) -> (batch, seq, d_out).

    Weights use the (in, out) layout, i.e. y = x @ w + b (equivalent to
    PyTorch's x @ W.T + b with W of shape (out, in)).
    compute_dtype: dtype for weights / MXU inputs (default x.dtype).
    out_dtype:     dtype of the returned array (default x.dtype).
    """
    batch, seq, d_in = x.shape
    d_hidden = w1.shape[1]
    d_out = w2.shape[1]
    out_dtype = jnp.dtype(out_dtype if out_dtype is not None else x.dtype)
    compute_dtype = jnp.dtype(compute_dtype if compute_dtype is not None
                              else x.dtype)
    M = batch * seq

    # --- lane packing: group P rows so feature axes become multiples of 128 ---
    P = 1
    if (d_in < 128 and d_out < 128 and
            128 % d_in == 0 and 128 % d_out == 0):
        P = max(128 // d_in, 128 // d_out)
        # Prefer 256-wide K/N (matches v6e/v7x's 2x256x256 MXU, still
        # 128-aligned on v5e) while the block-diagonal weights stay small.
        if 2 * P * max(d_in, d_hidden, d_out) <= 2048:
            P *= 2
        if P * max(d_in, d_hidden, d_out) > 2048:
            P = 1
    d_in_p, d_hid_p, d_out_p = P * d_in, P * d_hidden, P * d_out

    # --- packed (block-diagonal) weights and tiled biases --------------------
    w1p = _block_diag(w1.astype(compute_dtype), P)                 # (d_in_p, d_hid_p)
    w2p = _block_diag(w2.astype(compute_dtype), P)                 # (d_hid_p, d_out_p)
    b1p = jnp.tile(b1.astype(jnp.float32), P).reshape(1, d_hid_p)  # f32 bias add
    b2p = jnp.tile(b2.astype(jnp.float32), P).reshape(1, d_out_p)

    # --- packed input: pad ONLY to a multiple of P (< P rows) ----------------
    Mp = pl.cdiv(M, P)                              # packed row count
    M_pad = Mp * P
    x2 = x.reshape(M, d_in)
    if M_pad != M:
        # Tiny pad so the row-packing view is valid; the extra (< P) rows are
        # computed on zeros and sliced off before return.
        x2 = jnp.pad(x2, ((0, M_pad - M), (0, 0)))
    xp = x2.reshape(Mp, d_in_p)                     # free row-major view

    # --- row tiling in packed space (tm is in original-row units) ------------
    sub = 16 if 2 in (jnp.dtype(x.dtype).itemsize, out_dtype.itemsize,
                      compute_dtype.itemsize) else 8
    tr = _round_up(max(tm // P, 1), sub)
    # 2-TC awareness (v7x megacore): keep >= ~8 grid steps when the problem is
    # big enough so "parallel" sharding stays balanced across both TensorCores.
    min_steps = 8
    if Mp >= min_steps * 256 and pl.cdiv(Mp, tr) < min_steps:
        tr = max(_round_up(pl.cdiv(Mp, min_steps), sub), sub)
    if tr >= Mp:
        tr = Mp          # single block == full array dim (no (8,128) constraint)
    grid = (pl.cdiv(Mp, tr),)
    # NOTE: when tr does not divide Mp, Pallas clips the ragged final block on
    # store; any garbage it reads there never reaches the returned rows.

    # --- VMEM budget: only raise the scoped limit when big tiles need it -----
    x_bytes = jnp.dtype(x.dtype).itemsize
    o_bytes = out_dtype.itemsize
    c_bytes = compute_dtype.itemsize
    est_vmem = (2 * tr * d_in_p * x_bytes                         # x double-buffer
                + 2 * tr * d_out_p * o_bytes                      # out double-buffer
                + 2 * (d_in_p * d_hid_p + d_hid_p * d_out_p) * c_bytes  # weights
                + 2 * (d_hid_p + d_out_p) * 4                     # biases
                + tr * (d_hid_p + d_out_p) * 4)                   # f32 body temps
    compiler_kwargs = dict(dimension_semantics=("parallel",))
    if est_vmem > 12 * 1024 * 1024:
        compiler_kwargs["vmem_limit_bytes"] = int(
            min(2 * est_vmem, _vmem_cap_bytes()))

    out_p = pl.pallas_call(
        ffn_kernel,
        out_shape=jax.ShapeDtypeStruct((Mp, d_out_p), out_dtype),
        grid_spec=pltpu.PrefetchScalarGridSpec(
            num_scalar_prefetch=0,
            grid=grid,
            in_specs=[
                pl.BlockSpec((tr, d_in_p), lambda i: (i, 0)),        # x row tile
                pl.BlockSpec((d_in_p, d_hid_p), lambda i: (0, 0)),   # W1 (resident)
                pl.BlockSpec((1, d_hid_p), lambda i: (0, 0)),        # b1 (resident)
                pl.BlockSpec((d_hid_p, d_out_p), lambda i: (0, 0)),  # W2 (resident)
                pl.BlockSpec((1, d_out_p), lambda i: (0, 0)),        # b2 (resident)
            ],
            out_specs=pl.BlockSpec((tr, d_out_p), lambda i: (i, 0)), # lane-dense
        ),
        compiler_params=pltpu.CompilerParams(**compiler_kwargs),
    )(xp, w1p, b1p, w2p, b2p)

    out = out_p.reshape(M_pad, d_out)[:M]           # free view + slice off padding
    return out.reshape(batch, seq, d_out)


def ffn_reference(x, w1, b1, w2, b2):
    h = jnp.maximum(x @ w1 + b1, 0.0)
    return h @ w2 + b2


if __name__ == "__main__":
    # Module config: ffn_num_input=32, ffn_num_hiddens=64, ffn_num_outputs=32
    batch, seq = 2, 8
    d_in, d_hidden, d_out = 32, 64, 32

    key = jax.random.PRNGKey(0)
    kx, kw1, kb1, kw2, kb2 = jax.random.split(key, 5)

    x = jax.random.normal(kx, (batch, seq, d_in), dtype=jnp.float32)
    # Deterministic "init" of the Linear parameters (synthetic, not a checkpoint).
    w1 = jax.random.normal(kw1, (d_in, d_hidden), dtype=jnp.float32) * 0.1
    b1 = jax.random.normal(kb1, (d_hidden,), dtype=jnp.float32) * 0.1
    w2 = jax.random.normal(kw2, (d_hidden, d_out), dtype=jnp.float32) * 0.1
    b2 = jax.random.normal(kb2, (d_out,), dtype=jnp.float32) * 0.1

    ref = ffn_reference(x, w1, b1, w2, b2)

    # f32 path (exact module semantics).
    out = position_wise_ffn(x, w1, b1, w2, b2)
    out = jax.block_until_ready(out)
    assert out.shape == (batch, seq, d_out)
    assert jnp.allclose(out, ref, atol=1e-5, rtol=1e-5), "f32 mismatch vs reference"

    # bf16 compute path: weights in bf16, x cast in-kernel (no extra HBM pass).
    out_bf16 = position_wise_ffn(x, w1, b1, w2, b2, compute_dtype=jnp.bfloat16)
    out_bf16 = jax.block_until_ready(out_bf16)
    assert out_bf16.shape == (batch, seq, d_out)
    assert jnp.allclose(out_bf16, ref, atol=1e-1, rtol=1e-1), "bf16 mismatch vs reference"

    print("KERNEL_OK")
</pallas_src>

<mosaic_0001>
module attributes {stable_mosaic.version = 11 : i64} {
  func.func @ffn_kernel(%arg0: i32, %arg1: memref<2x256xf32, #tpu.memory_space<vmem>>, %arg2: memref<256x512xf32, #tpu.memory_space<vmem>>, %arg3: memref<1x512xf32, #tpu.memory_space<vmem>>, %arg4: memref<512x256xf32, #tpu.memory_space<vmem>>, %arg5: memref<1x256xf32, #tpu.memory_space<vmem>>, %arg6: memref<2x256xf32, #tpu.memory_space<vmem>>) attributes {dimension_semantics = [#tpu.dimension_semantics<parallel>], iteration_bounds = array<i64: 1>, scalar_prefetch = 0 : i64, scratch_operands = 0 : i64, tpu.core_type = #tpu.core_type<tc>, window_params = [{transform_indices = @transform_0, window_bounds = array<i64: 2, 256>}, {pipeline_mode = #tpu.pipeline_mode<synchronous>, transform_indices = @transform_1, window_bounds = array<i64: 256, 512>}, {pipeline_mode = #tpu.pipeline_mode<synchronous>, transform_indices = @transform_2, window_bounds = array<i64: 1, 512>}, {pipeline_mode = #tpu.pipeline_mode<synchronous>, transform_indices = @transform_3, window_bounds = array<i64: 512, 256>}, {pipeline_mode = #tpu.pipeline_mode<synchronous>, transform_indices = @transform_4, window_bounds = array<i64: 1, 256>}, {transform_indices = @transform_5, window_bounds = array<i64: 2, 256>}]} {
    %c0 = arith.constant 0 : index
    %c0_0 = arith.constant 0 : index
    %0 = vector.load %arg1[%c0, %c0_0] : memref<2x256xf32, #tpu.memory_space<vmem>>, vector<2x256xf32>
    %c0_1 = arith.constant 0 : index
    %c0_2 = arith.constant 0 : index
    %1 = vector.load %arg2[%c0_1, %c0_2] : memref<256x512xf32, #tpu.memory_space<vmem>>, vector<256x512xf32>
    %cst = arith.constant dense<0.000000e+00> : vector<2x512xf32>
    %2 = tpu.matmul %0, %1, %cst {dimension_numbers = #tpu.dot_dimension_numbers<[1], [0], [0], [1], [0, 0, 1, 1], [], []>} : vector<2x256xf32>, vector<256x512xf32>, vector<2x512xf32> -> vector<2x512xf32>
    %c0_3 = arith.constant 0 : index
    %c0_4 = arith.constant 0 : index
    %3 = vector.load %arg3[%c0_3, %c0_4] : memref<1x512xf32, #tpu.memory_space<vmem>>, vector<1x512xf32>
    %4 = vector.broadcast %3 : vector<1x512xf32> to vector<2x512xf32>
    %5 = arith.addf %2, %4 : vector<2x512xf32>
    %cst_5 = arith.constant 0.000000e+00 : f32
    %6 = vector.broadcast %cst_5 : f32 to vector<2x512xf32>
    %7 = arith.maximumf %5, %6 : vector<2x512xf32>
    %c0_6 = arith.constant 0 : index
    %c0_7 = arith.constant 0 : index
    %8 = vector.load %arg4[%c0_6, %c0_7] : memref<512x256xf32, #tpu.memory_space<vmem>>, vector<512x256xf32>
    %cst_8 = arith.constant dense<0.000000e+00> : vector<2x256xf32>
    %9 = tpu.matmul %7, %8, %cst_8 {dimension_numbers = #tpu.dot_dimension_numbers<[1], [0], [0], [1], [0, 0, 1, 1], [], []>} : vector<2x512xf32>, vector<512x256xf32>, vector<2x256xf32> -> vector<2x256xf32>
    %c0_9 = arith.constant 0 : index
    %c0_10 = arith.constant 0 : index
    %10 = vector.load %arg5[%c0_9, %c0_10] : memref<1x256xf32, #tpu.memory_space<vmem>>, vector<1x256xf32>
    %11 = vector.broadcast %10 : vector<1x256xf32> to vector<2x256xf32>
    %12 = arith.addf %9, %11 : vector<2x256xf32>
    %c0_11 = arith.constant 0 : index
    %c0_12 = arith.constant 0 : index
    %13 = vector.load %arg6[%c0_11, %c0_12] : memref<2x256xf32, #tpu.memory_space<vmem>>, vector<2x256xf32>
    tpu.vector_store %arg6[%c0_11, %c0_12], %12 {strides = array<i32>} : memref<2x256xf32, #tpu.memory_space<vmem>>, vector<2x256xf32>,
    return
  }
  func.func @transform_0(%arg0: i32) -> (i32, i32) {
    %c0_i32 = arith.constant 0 : i32
    %c0_i32_0 = arith.constant 0 : i32
    return %arg0, %c0_i32 : i32, i32
  }
  func.func @transform_1(%arg0: i32) -> (i32, i32) {
    %c0_i32 = arith.constant 0 : i32
    %c0_i32_0 = arith.constant 0 : i32
    %c0_i32_1 = arith.constant 0 : i32
    return %c0_i32, %c0_i32_0 : i32, i32
  }
  func.func @transform_2(%arg0: i32) -> (i32, i32) {
    %c0_i32 = arith.constant 0 : i32
    %c0_i32_0 = arith.constant 0 : i32
    %c0_i32_1 = arith.constant 0 : i32
    return %c0_i32, %c0_i32_0 : i32, i32
  }
  func.func @transform_3(%arg0: i32) -> (i32, i32) {
    %c0_i32 = arith.constant 0 : i32
    %c0_i32_0 = arith.constant 0 : i32
    %c0_i32_1 = arith.constant 0 : i32
    return %c0_i32, %c0_i32_0 : i32, i32
  }
  func.func @transform_4(%arg0: i32) -> (i32, i32) {
    %c0_i32 = arith.constant 0 : i32
    %c0_i32_0 = arith.constant 0 : i32
    %c0_i32_1 = arith.constant 0 : i32
    return %c0_i32, %c0_i32_0 : i32, i32
  }
  func.func @transform_5(%arg0: i32) -> (i32, i32) {
    %c0_i32 = arith.constant 0 : i32
    %c0_i32_0 = arith.constant 0 : i32
    return %arg0, %c0_i32 : i32, i32
  }
}

</mosaic_0001>

<bundles_post_ra>
// kernel: tpu_custom_call.1
= control target key start
LH: loop header
LB: loop body
LE: loop exit
PB: predicated region body
PF: predicated region fallthrough
CT: control target
= control target key end

     0   :  { %10 = vsyncpa [#allocation3], 0  ;;  %s867_s0 = inlined_call_operand.hbm [shape: f32[2,256], index: 0, kind: input, shape index: {}]   ;;  %s868_s1 = inlined_call_operand.hbm [shape: f32[256,512], index: 1, kind: input, shape index: {}]   ;;  %s869_s2 = inlined_call_operand.hbm [shape: f32[1,512], index: 2, kind: input, shape index: {}]   ;;  %s870_s3 = inlined_call_operand.hbm [shape: f32[512,256], index: 3, kind: input, shape index: {}]   ;;  %s871_s4 = inlined_call_operand.vmem [shape: f32[1,256], index: 4, kind: input, shape index: {}]   ;;  %s872_s5 = inlined_call_operand.hbm [shape: f32[2,256], index: 5, kind: output, shape index: {}]  }
   0x1   :  { %11 = vsyncpa [#allocation6], 0 }
   0x2   :  { %12 = vsyncpa [#allocation9], 0 }
   0x3   :  { %13 = vsyncpa [#allocation4], 0  ;;  %s810_s18 = smov [#allocation5]  }
   0x4   :  { %s29_s19 = sshll.u32 %s810_s18, 4  ;;  %s30_s19 = int_to_ptr.vmem [resolvable:$true] %s29_s19 }
   0x5   :  { %s710_s20 = scalar_lea.vmem %s30_s19, 16384  ;;  %p715_p1 = scmp.lt.s32.totalorder %s30_s19, %s30_s19 }
   0x6   :  { %p711_p0 = scmp.ne.s32.totalorder %s30_s19, %s710_s20  ;;  %p716_p2 = scmp.lt.s32.totalorder %s710_s20, %s710_s20 }
   0x8   :  { %p717_p3 = por %p716_p2, %p715_p1 }
   0xa   :  { %p718_p4 = pnand %p717_p3, %p711_p0 }
   0xc   :  { %721 = shalt.err (!%p718_p4)
}
   0xd   :  { %s811_s21 = smov 512   ;;  %s812_s22 = smov 32  }
   0xe   :  { %35 = dma.hbm_to_vmem [thread:$0]  %s868_s1, 16384, %s30_s19, [#allocation6], %s811_s21, %s811_s21, %s812_s22  }
   0xf   :  { %s813_s25 = smov [#allocation2]   ;;  %s814_s27 = smov [#allocation7]  }
  0x10   :  { %s20_s26 = sshll.u32 %s813_s25, 4  ;;  %s42_s28 = sshll.u32 %s814_s27, 4  ;;  %s21_s26 = int_to_ptr.vmem [resolvable:$true] %s20_s26  ;;  %s43_s28 = int_to_ptr.vmem [resolvable:$true] %s42_s28 }
  0x11   :  { %s730_s29 = scalar_lea.vmem %s21_s26, 64  ;;  %p735_p6 = scmp.lt.s32.totalorder %s21_s26, %s21_s26 }
  0x12   :  { %p731_p5 = scmp.ne.s32.totalorder %s21_s26, %s730_s29  ;;  %p736_p7 = scmp.lt.s32.totalorder %s730_s29, %s730_s29 }
  0x14   :  { %p737_p8 = por %p736_p7, %p735_p6 }
  0x16   :  { %p738_p9 = pnand %p737_p8, %p731_p5 }
  0x18   :  { %741 = shalt.err (!%p738_p9)
}
  0x19   :  { %23 = dma.hbm_to_vmem [thread:$0]  %s867_s0, 64, %s21_s26, [#allocation3]  }
  0x1a   :  { %s750_s7 = scalar_lea.vmem %s43_s28, 64  ;;  %p755_p11 = scmp.lt.s32.totalorder %s43_s28, %s43_s28 }
  0x1b   :  { %p751_p10 = scmp.ne.s32.totalorder %s43_s28, %s750_s7  ;;  %p756_p12 = scmp.lt.s32.totalorder %s750_s7, %s750_s7 }
  0x1d   :  { %p757_p13 = por %p756_p12, %p755_p11 }
  0x1f   :  { %p758_p0 = pnand %p757_p13, %p751_p10 }
  0x21   :  { %761 = shalt.err (!%p758_p0)
}
  0x22   :  { %45 = dma.hbm_to_vmem [thread:$0]  %s869_s2, 64, %s43_s28, [#allocation6]  }
  0x23   :  { %s815_s9 = smov [#allocation8]  }
  0x24   :  { %s51_s10 = sshll.u32 %s815_s9, 4  ;;  %s52_s10 = int_to_ptr.vmem [resolvable:$true] %s51_s10 }
  0x25   :  { %s770_s11 = scalar_lea.vmem %s52_s10, 16384  ;;  %p775_p2 = scmp.lt.s32.totalorder %s52_s10, %s52_s10 }
  0x26   :  { %p771_p1 = scmp.ne.s32.totalorder %s52_s10, %s770_s11  ;;  %p776_p3 = scmp.lt.s32.totalorder %s770_s11, %s770_s11 }
  0x28   :  { %p777_p4 = por %p776_p3, %p775_p2 }
  0x2a   :  { %p778_p5 = pnand %p777_p4, %p771_p1 }
  0x2c   :  { %781 = shalt.err (!%p778_p5)
}
  0x2d   :  { %s816_s0 = smov 256   ;;  %s817_s12 = smov 16  }
  0x2e   :  { %57 = dma.hbm_to_vmem [thread:$0]  %s870_s3, 16384, %s52_s10, [#allocation9], %s816_s0, %s816_s0, %s817_s12  }
  0x2f   :  { %802 = dma.done.wait [#allocation3], 64  }
  0x30   :  { %803 = vsyncadd [#allocation3], 4294967232 }
  0x31   :  { %804 = dma.done.wait [#allocation6], 16448  }
  0x32   :  { %805 = vsyncadd [#allocation6], 4294950848 }
  0x33   :  { %806 = dma.done.wait [#allocation9], 16384  }
  0x34   :  { %807 = vsyncadd [#allocation9], 4294950912  ;;  %v134_v0 = vld [vmem:[#allocation5 + $0x1e8] sm:$0xff]  ;;  %v136_v1 = vld [vmem:[#allocation5 + $0x1f8] sm:$0xff]  ;;  %s818_s15 = smov [#allocation10]  }
  0x35   :  { %v133_v2 = vld [vmem:[#allocation5 + $0x1e0] sm:$0xff]  ;;  %234 = vmatprep.subr.mxu0 %v134_v0  ;;  %305 = vmatprep.subr.mxu1 %v136_v1  ;;  %v135_v3 = vld [vmem:[#allocation5 + $0x1f0] sm:$0xff]  ;;  %v130_v4 = vld [vmem:[#allocation5 + $0x1c8] sm:$0xff]  ;;  %s680_s16 = sshll.u32 %s818_s15, 4  ;;  %s681_s16 = int_to_ptr.vmem [resolvable:$true] %s680_s16 }
  0x36   :  { %v132_v5 = vld [vmem:[#allocation5 + $0x1d8] sm:$0xff]  ;;  %235 = vmatpush1.msra.mxu0 %v133_v2  ;;  %306 = vmatpush1.msra.mxu1 %v135_v3  ;;  %v129_v6 = vld [vmem:[#allocation5 + $0x1c0] sm:$0xff]  ;;  %v131_v7 = vld [vmem:[#allocation5 + $0x1d0] sm:$0xff]  ;;  %s782_s17 = scalar_lea.vmem %s681_s16, 64  ;;  %p787_p7 = scmp.lt.s32.totalorder %s681_s16, %s681_s16 }
  0x37   :  { %v126_v8 = vld [vmem:[#allocation5 + $0x1a8] sm:$0xff]  ;;  %236 = vmatprep.subr.mxu0 %v130_v4  ;;  %307 = vmatprep.subr.mxu1 %v132_v5  ;;  %v128_v9 = vld [vmem:[#allocation5 + $0x1b8] sm:$0xff]  ;;  %v125_v10 = vld [vmem:[#allocation5 + $0x1a0] sm:$0xff]  ;;  %p783_p6 = scmp.ne.s32.totalorder %s681_s16, %s782_s17  ;;  %p788_p8 = scmp.lt.s32.totalorder %s782_s17, %s782_s17 }
  0x38   :  { %v127_v11 = vld [vmem:[#allocation5 + $0x1b0] sm:$0xff]  ;;  %237 = vmatpush1.msra.mxu0 %v129_v6  ;;  %308 = vmatpush1.msra.mxu1 %v131_v7  ;;  %v122_v12 = vld [vmem:[#allocation5 + $0x188] sm:$0xff]  ;;  %v124_v13 = vld [vmem:[#allocation5 + $0x198] sm:$0xff] }
  0x39   :  { %238 = vmatprep.subr.mxu0 %v126_v8  ;;  %309 = vmatprep.subr.mxu1 %v128_v9  ;;  %v121_v14 = vld [vmem:[#allocation5 + $0x180] sm:$0xff]  ;;  %v123_v15 = vld [vmem:[#allocation5 + $0x190] sm:$0xff]  ;;  %v118_v16 = vld [vmem:[#allocation5 + $0x168] sm:$0xff]  ;;  %p789_p9 = por %p788_p8, %p787_p7 }
  0x3a   :  { %239 = vmatpush1.msra.mxu0 %v125_v10  ;;  %310 = vmatpush1.msra.mxu1 %v127_v11  ;;  %v120_v17 = vld [vmem:[#allocation5 + $0x178] sm:$0xff]  ;;  %v117_v18 = vld [vmem:[#allocation5 + $0x160] sm:$0xff]  ;;  %v119_v19 = vld [vmem:[#allocation5 + $0x170] sm:$0xff] }
  0x3b   :  { %240 = vmatprep.subr.mxu0 %v122_v12  ;;  %311 = vmatprep.subr.mxu1 %v124_v13  ;;  %v114_v20 = vld [vmem:[#allocation5 + $0x148] sm:$0xff]  ;;  %v116_v21 = vld [vmem:[#allocation5 + $0x158] sm:$0xff]  ;;  %v113_v22 = vld [vmem:[#allocation5 + $0x140] sm:$0xff]  ;;  %p790_p10 = pnand %p789_p9, %p783_p6 }
  0x3c   :  { %241 = vmatpush1.msra.mxu0 %v121_v14  ;;  %312 = vmatpush1.msra.mxu1 %v123_v15  ;;  %v115_v23 = vld [vmem:[#allocation5 + $0x150] sm:$0xff]  ;;  %v110_v24 = vld [vmem:[#allocation5 + $0x128] sm:$0xff]  ;;  %v112_v25 = vld [vmem:[#allocation5 + $0x138] sm:$0xff] }
  0x3d   :  { %242 = vmatprep.subr.mxu0 %v118_v16  ;;  %313 = vmatprep.subr.mxu1 %v120_v17  ;;  %v109_v26 = vld [vmem:[#allocation5 + $0x120] sm:$0xff]  ;;  %v111_v27 = vld [vmem:[#allocation5 + $0x130] sm:$0xff]  ;;  %v106_v28 = vld [vmem:[#allocation5 + $0x108] sm:$0xff] }
  0x3e   :  { %243 = vmatpush1.msra.mxu0 %v117_v18  ;;  %314 = vmatpush1.msra.mxu1 %v119_v19  ;;  %v108_v29 = vld [vmem:[#allocation5 + $0x118] sm:$0xff]  ;;  %v105_v30 = vld [vmem:[#allocation5 + $0x100] sm:$0xff]  ;;  %v107_v31 = vld [vmem:[#allocation5 + $0x110] sm:$0xff] }
  0x3f   :  { %244 = vmatprep.subr.mxu0 %v114_v20  ;;  %315 = vmatprep.subr.mxu1 %v116_v21  ;;  %v102_v32 = vld [vmem:[#allocation5 + $0xe8] sm:$0xff]  ;;  %v104_v33 = vld [vmem:[#allocation5 + $0xf8] sm:$0xff]  ;;  %v101_v34 = vld [vmem:[#allocation5 + $0xe0] sm:$0xff] }
  0x40   :  { %245 = vmatpush1.msra.mxu0 %v113_v22  ;;  %316 = vmatpush1.msra.mxu1 %v115_v23  ;;  %v103_v35 = vld [vmem:[#allocation5 + $0xf0] sm:$0xff]  ;;  %v98_v36 = vld [vmem:[#allocation5 + $0xc8] sm:$0xff]  ;;  %v100_v37 = vld [vmem:[#allocation5 + $0xd8] sm:$0xff] }
  0x41   :  { %246 = vmatprep.subr.mxu0 %v110_v24  ;;  %317 = vmatprep.subr.mxu1 %v112_v25  ;;  %v97_v38 = vld [vmem:[#allocation5 + $0xc0] sm:$0xff]  ;;  %v99_v39 = vld [vmem:[#allocation5 + $0xd0] sm:$0xff]  ;;  %v94_v40 = vld [vmem:[#allocation5 + $0xa8] sm:$0xff] }
  0x42   :  { %247 = vmatpush1.msra.mxu0 %v109_v26  ;;  %318 = vmatpush1.msra.mxu1 %v111_v27  ;;  %v96_v41 = vld [vmem:[#allocation5 + $0xb8] sm:$0xff]  ;;  %v93_v42 = vld [vmem:[#allocation5 + $0xa0] sm:$0xff]  ;;  %v95_v43 = vld [vmem:[#allocation5 + $0xb0] sm:$0xff] }
  0x43   :  { %248 = vmatprep.subr.mxu0 %v106_v28  ;;  %319 = vmatprep.subr.mxu1 %v108_v29  ;;  %v90_v44 = vld [vmem:[#allocation5 + $0x88] sm:$0xff]  ;;  %v92_v45 = vld [vmem:[#allocation5 + $0x98] sm:$0xff]  ;;  %v89_v46 = vld [vmem:[#allocation5 + $0x80] sm:$0xff] }
  0x44   :  { %249 = vmatpush1.msra.mxu0 %v105_v30  ;;  %320 = vmatpush1.msra.mxu1 %v107_v31  ;;  %v91_v47 = vld [vmem:[#allocation5 + $0x90] sm:$0xff]  ;;  %v86_v48 = vld [vmem:[#allocation5 + $0x68] sm:$0xff]  ;;  %v88_v49 = vld [vmem:[#allocation5 + $0x78] sm:$0xff] }
  0x45   :  { %250 = vmatprep.subr.mxu0 %v102_v32  ;;  %321 = vmatprep.subr.mxu1 %v104_v33  ;;  %v85_v50 = vld [vmem:[#allocation5 + $0x60] sm:$0xff]  ;;  %v87_v51 = vld [vmem:[#allocation5 + $0x70] sm:$0xff]  ;;  %v82_v52 = vld [vmem:[#allocation5 + $0x48] sm:$0xff] }
  0x46   :  { %251 = vmatpush1.msra.mxu0 %v101_v34  ;;  %322 = vmatpush1.msra.mxu1 %v103_v35  ;;  %v84_v53 = vld [vmem:[#allocation5 + $0x58] sm:$0xff]  ;;  %v81_v54 = vld [vmem:[#allocation5 + $0x40] sm:$0xff]  ;;  %v83_v55 = vld [vmem:[#allocation5 + $0x50] sm:$0xff] }
  0x47   :  { %252 = vmatprep.subr.mxu0 %v98_v36  ;;  %323 = vmatprep.subr.mxu1 %v100_v37  ;;  %v78_v56 = vld [vmem:[#allocation5 + $0x28] sm:$0xff]  ;;  %v80_v57 = vld [vmem:[#allocation5 + $0x38] sm:$0xff]  ;;  %v77_v58 = vld [vmem:[#allocation5 + $0x20] sm:$0xff] }
  0x48   :  { %253 = vmatpush1.msra.mxu0 %v97_v38  ;;  %324 = vmatpush1.msra.mxu1 %v99_v39  ;;  %v79_v59 = vld [vmem:[#allocation5 + $0x30] sm:$0xff]  ;;  %v74_v60 = vld [vmem:[#allocation5 + $0x8] sm:$0xff]  ;;  %v76_v61 = vld [vmem:[#allocation5 + $0x18] sm:$0xff] }
  0x49   :  { %254 = vmatprep.subr.mxu0 %v94_v40  ;;  %325 = vmatprep.subr.mxu1 %v96_v41  ;;  %v73_v62 = vld [vmem:[#allocation5] sm:$0xff]  ;;  %v75_v63 = vld [vmem:[#allocation5 + $0x10] sm:$0xff]  ;;  %v198_v0 = vld [vmem:[#allocation5 + $0x3e8] sm:$0xff] }
  0x4a   :  { %255 = vmatpush1.msra.mxu0 %v93_v42  ;;  %326 = vmatpush1.msra.mxu1 %v95_v43  ;;  %v200_v1 = vld [vmem:[#allocation5 + $0x3f8] sm:$0xff]  ;;  %v197_v2 = vld [vmem:[#allocation5 + $0x3e0] sm:$0xff]  ;;  %v199_v3 = vld [vmem:[#allocation5 + $0x3f0] sm:$0xff] }
  0x4b   :  { %256 = vmatprep.subr.mxu0 %v90_v44  ;;  %327 = vmatprep.subr.mxu1 %v92_v45  ;;  %v194_v4 = vld [vmem:[#allocation5 + $0x3c8] sm:$0xff]  ;;  %v196_v5 = vld [vmem:[#allocation5 + $0x3d8] sm:$0xff]  ;;  %v193_v6 = vld [vmem:[#allocation5 + $0x3c0] sm:$0xff] }
  0x4c   :  { %257 = vmatpush1.msra.mxu0 %v89_v46  ;;  %328 = vmatpush1.msra.mxu1 %v91_v47  ;;  %v195_v7 = vld [vmem:[#allocation5 + $0x3d0] sm:$0xff]  ;;  %v190_v8 = vld [vmem:[#allocation5 + $0x3a8] sm:$0xff]  ;;  %v192_v9 = vld [vmem:[#allocation5 + $0x3b8] sm:$0xff] }
  0x4d   :  { %258 = vmatprep.subr.mxu0 %v86_v48  ;;  %329 = vmatprep.subr.mxu1 %v88_v49  ;;  %v189_v10 = vld [vmem:[#allocation5 + $0x3a0] sm:$0xff]  ;;  %v191_v11 = vld [vmem:[#allocation5 + $0x3b0] sm:$0xff]  ;;  %v186_v12 = vld [vmem:[#allocation5 + $0x388] sm:$0xff] }
  0x4e   :  { %259 = vmatpush1.msra.mxu0 %v85_v50  ;;  %330 = vmatpush1.msra.mxu1 %v87_v51  ;;  %v188_v13 = vld [vmem:[#allocation5 + $0x398] sm:$0xff]  ;;  %v185_v14 = vld [vmem:[#allocation5 + $0x380] sm:$0xff]  ;;  %v187_v15 = vld [vmem:[#allocation5 + $0x390] sm:$0xff] }
  0x4f   :  { %260 = vmatprep.subr.mxu0 %v82_v52  ;;  %331 = vmatprep.subr.mxu1 %v84_v53  ;;  %v182_v16 = vld [vmem:[#allocation5 + $0x368] sm:$0xff]  ;;  %v184_v17 = vld [vmem:[#allocation5 + $0x378] sm:$0xff]  ;;  %v181_v18 = vld [vmem:[#allocation5 + $0x360] sm:$0xff] }
  0x50   :  { %261 = vmatpush1.msra.mxu0 %v81_v54  ;;  %332 = vmatpush1.msra.mxu1 %v83_v55  ;;  %v183_v19 = vld [vmem:[#allocation5 + $0x370] sm:$0xff]  ;;  %v178_v20 = vld [vmem:[#allocation5 + $0x348] sm:$0xff]  ;;  %v180_v21 = vld [vmem:[#allocation5 + $0x358] sm:$0xff] }
  0x51   :  { %262 = vmatprep.subr.mxu0 %v78_v56  ;;  %333 = vmatprep.subr.mxu1 %v80_v57  ;;  %v177_v22 = vld [vmem:[#allocation5 + $0x340] sm:$0xff]  ;;  %v179_v23 = vld [vmem:[#allocation5 + $0x350] sm:$0xff]  ;;  %v174_v24 = vld [vmem:[#allocation5 + $0x328] sm:$0xff] }
  0x52   :  { %263 = vmatpush1.msra.mxu0 %v77_v58  ;;  %334 = vmatpush1.msra.mxu1 %v79_v59  ;;  %v176_v25 = vld [vmem:[#allocation5 + $0x338] sm:$0xff]  ;;  %v173_v26 = vld [vmem:[#allocation5 + $0x320] sm:$0xff]  ;;  %v175_v27 = vld [vmem:[#allocation5 + $0x330] sm:$0xff] }
  0x53   :  { %264 = vmatprep.subr.mxu0 %v74_v60  ;;  %335 = vmatprep.subr.mxu1 %v76_v61  ;;  %v170_v28 = vld [vmem:[#allocation5 + $0x308] sm:$0xff]  ;;  %v172_v29 = vld [vmem:[#allocation5 + $0x318] sm:$0xff]  ;;  %v169_v30 = vld [vmem:[#allocation5 + $0x300] sm:$0xff] }
  0x54   :  { %265 = vmatpush1.msra.mxu0 %v73_v62  ;;  %336 = vmatpush1.msra.mxu1 %v75_v63  ;;  %v171_v31 = vld [vmem:[#allocation5 + $0x310] sm:$0xff]  ;;  %v166_v32 = vld [vmem:[#allocation5 + $0x2e8] sm:$0xff]  ;;  %v168_v33 = vld [vmem:[#allocation5 + $0x2f8] sm:$0xff] }
  0x55   :  { %266 = vmatprep.subr.mxu0 %v198_v0  ;;  %337 = vmatprep.subr.mxu1 %v200_v1  ;;  %v165_v34 = vld [vmem:[#allocation5 + $0x2e0] sm:$0xff]  ;;  %v167_v35 = vld [vmem:[#allocation5 + $0x2f0] sm:$0xff]  ;;  %v162_v36 = vld [vmem:[#allocation5 + $0x2c8] sm:$0xff] }
  0x56   :  { %267 = vmatpush2.msra.mxu0 %v197_v2  ;;  %338 = vmatpush2.msra.mxu1 %v199_v3  ;;  %v164_v37 = vld [vmem:[#allocation5 + $0x2d8] sm:$0xff]  ;;  %v161_v38 = vld [vmem:[#allocation5 + $0x2c0] sm:$0xff]  ;;  %v163_v39 = vld [vmem:[#allocation5 + $0x2d0] sm:$0xff] }
  0x57   :  { %268 = vmatprep.subr.mxu0 %v194_v4  ;;  %339 = vmatprep.subr.mxu1 %v196_v5  ;;  %v158_v40 = vld [vmem:[#allocation5 + $0x2a8] sm:$0xff]  ;;  %v160_v41 = vld [vmem:[#allocation5 + $0x2b8] sm:$0xff]  ;;  %v157_v42 = vld [vmem:[#allocation5 + $0x2a0] sm:$0xff] }
  0x58   :  { %269 = vmatpush2.msra.mxu0 %v193_v6  ;;  %340 = vmatpush2.msra.mxu1 %v195_v7  ;;  %v159_v43 = vld [vmem:[#allocation5 + $0x2b0] sm:$0xff]  ;;  %v154_v44 = vld [vmem:[#allocation5 + $0x288] sm:$0xff]  ;;  %v156_v45 = vld [vmem:[#allocation5 + $0x298] sm:$0xff] }
  0x59   :  { %270 = vmatprep.subr.mxu0 %v190_v8  ;;  %341 = vmatprep.subr.mxu1 %v192_v9  ;;  %v153_v46 = vld [vmem:[#allocation5 + $0x280] sm:$0xff]  ;;  %v155_v47 = vld [vmem:[#allocation5 + $0x290] sm:$0xff]  ;;  %v150_v48 = vld [vmem:[#allocation5 + $0x268] sm:$0xff] }
  0x5a   :  { %271 = vmatpush2.msra.mxu0 %v189_v10  ;;  %342 = vmatpush2.msra.mxu1 %v191_v11  ;;  %v152_v49 = vld [vmem:[#allocation5 + $0x278] sm:$0xff]  ;;  %v149_v50 = vld [vmem:[#allocation5 + $0x260] sm:$0xff]  ;;  %v151_v51 = vld [vmem:[#allocation5 + $0x270] sm:$0xff] }
  0x5b   :  { %272 = vmatprep.subr.mxu0 %v186_v12  ;;  %343 = vmatprep.subr.mxu1 %v188_v13  ;;  %v146_v52 = vld [vmem:[#allocation5 + $0x248] sm:$0xff]  ;;  %v148_v53 = vld [vmem:[#allocation5 + $0x258] sm:$0xff]  ;;  %v145_v54 = vld [vmem:[#allocation5 + $0x240] sm:$0xff] }
  0x5c   :  { %273 = vmatpush2.msra.mxu0 %v185_v14  ;;  %344 = vmatpush2.msra.mxu1 %v187_v15  ;;  %v147_v55 = vld [vmem:[#allocation5 + $0x250] sm:$0xff]  ;;  %v691_v56 = vld.sshfl [vmem:[#allocation2] sm:$0x33 pattern:$0x76325410]  ;;  %v142_v57 = vld [vmem:[#allocation5 + $0x228] sm:$0xff] }
  0x5d   :  { %274 = vmatprep.subr.mxu0 %v182_v16  ;;  %345 = vmatprep.subr.mxu1 %v184_v17  ;;  %v144_v58 = vld [vmem:[#allocation5 + $0x238] sm:$0xff]  ;;  %v141_v59 = vld [vmem:[#allocation5 + $0x220] sm:$0xff]  ;;  %v143_v60 = vld [vmem:[#allocation5 + $0x230] sm:$0xff]  ;;  %v231_v63 = vcombine.high %v691_v56, %v691_v56 }
  0x5e   :  { %275 = vmatpush2.msra.mxu0 %v181_v18  ;;  %346 = vmatpush2.msra.mxu1 %v183_v19  ;;  %v138_v61 = vld [vmem:[#allocation5 + $0x208] sm:$0xff]  ;;  %v140_v62 = vld [vmem:[#allocation5 + $0x218] sm:$0xff]  ;;  %v137_v0 = vld [vmem:[#allocation5 + $0x200] sm:$0xff] }
  0x5f   :  { %276 = vmatprep.subr.mxu0 %v178_v20  ;;  %347 = vmatprep.subr.mxu1 %v180_v21  ;;  %v139_v1 = vld [vmem:[#allocation5 + $0x210] sm:$0xff]  ;;  %v411_v2 = vld [vmem:[#allocation8 + $0xf8] sm:$0xff]  ;;  %v408_v8 = vld [vmem:[#allocation8 + $0xe0] sm:$0xff] }
  0x60   :  { %277 = vmatpush2.msra.mxu0 %v177_v22  ;;  %348 = vmatpush2.msra.mxu1 %v179_v23  ;;  %v475_v3 = vld [vmem:[#allocation8 + $0x2f8] sm:$0xff]  ;;  %v410_v4 = vld [vmem:[#allocation8 + $0xf0] sm:$0xff]  ;;  %v409_v6 = vld [vmem:[#allocation8 + $0xe8] sm:$0xff] }
  0x61   :  { %278 = vmatprep.subr.mxu0 %v174_v24  ;;  %349 = vmatprep.subr.mxu1 %v176_v25  ;;  %v474_v5 = vld [vmem:[#allocation8 + $0x2f0] sm:$0xff]  ;;  %v473_v7 = vld [vmem:[#allocation8 + $0x2e8] sm:$0xff]  ;;  %v472_v9 = vld [vmem:[#allocation8 + $0x2e0] sm:$0xff] }
  0x62   :  { %279 = vmatpush2.msra.mxu0 %v173_v26  ;;  %350 = vmatpush2.msra.mxu1 %v175_v27  ;;  %v407_v10 = vld [vmem:[#allocation8 + $0xd8] sm:$0xff]  ;;  %v406_v12 = vld [vmem:[#allocation8 + $0xd0] sm:$0xff]  ;;  %v405_v14 = vld [vmem:[#allocation8 + $0xc8] sm:$0xff] }
  0x63   :  { %280 = vmatprep.subr.mxu0 %v170_v28  ;;  %351 = vmatprep.subr.mxu1 %v172_v29  ;;  %v471_v11 = vld [vmem:[#allocation8 + $0x2d8] sm:$0xff]  ;;  %v470_v13 = vld [vmem:[#allocation8 + $0x2d0] sm:$0xff]  ;;  %v469_v15 = vld [vmem:[#allocation8 + $0x2c8] sm:$0xff] }
  0x64   :  { %281 = vmatpush2.msra.mxu0 %v169_v30  ;;  %352 = vmatpush2.msra.mxu1 %v171_v31  ;;  %v404_v16 = vld [vmem:[#allocation8 + $0xc0] sm:$0xff]  ;;  %v403_v18 = vld [vmem:[#allocation8 + $0xb8] sm:$0xff]  ;;  %v402_v20 = vld [vmem:[#allocation8 + $0xb0] sm:$0xff] }
  0x65   :  { %282 = vmatprep.subr.mxu0 %v166_v32  ;;  %353 = vmatprep.subr.mxu1 %v168_v33  ;;  %v468_v17 = vld [vmem:[#allocation8 + $0x2c0] sm:$0xff]  ;;  %v467_v19 = vld [vmem:[#allocation8 + $0x2b8] sm:$0xff]  ;;  %v466_v21 = vld [vmem:[#allocation8 + $0x2b0] sm:$0xff] }
  0x66   :  { %283 = vmatpush2.msra.mxu0 %v165_v34  ;;  %354 = vmatpush2.msra.mxu1 %v167_v35  ;;  %v401_v22 = vld [vmem:[#allocation8 + $0xa8] sm:$0xff]  ;;  %v400_v24 = vld [vmem:[#allocation8 + $0xa0] sm:$0xff]  ;;  %v399_v26 = vld [vmem:[#allocation8 + $0x98] sm:$0xff] }
  0x67   :  { %284 = vmatprep.subr.mxu0 %v162_v36  ;;  %355 = vmatprep.subr.mxu1 %v164_v37  ;;  %v465_v23 = vld [vmem:[#allocation8 + $0x2a8] sm:$0xff]  ;;  %v464_v25 = vld [vmem:[#allocation8 + $0x2a0] sm:$0xff]  ;;  %v463_v27 = vld [vmem:[#allocation8 + $0x298] sm:$0xff] }
  0x68   :  { %285 = vmatpush2.msra.mxu0 %v161_v38  ;;  %356 = vmatpush2.msra.mxu1 %v163_v39  ;;  %v398_v28 = vld [vmem:[#allocation8 + $0x90] sm:$0xff]  ;;  %v397_v30 = vld [vmem:[#allocation8 + $0x88] sm:$0xff]  ;;  %v396_v32 = vld [vmem:[#allocation8 + $0x80] sm:$0xff] }
  0x69   :  { %286 = vmatprep.subr.mxu0 %v158_v40  ;;  %357 = vmatprep.subr.mxu1 %v160_v41  ;;  %v462_v29 = vld [vmem:[#allocation8 + $0x290] sm:$0xff]  ;;  %v461_v31 = vld [vmem:[#allocation8 + $0x288] sm:$0xff]  ;;  %v460_v33 = vld [vmem:[#allocation8 + $0x280] sm:$0xff] }
  0x6a   :  { %287 = vmatpush2.msra.mxu0 %v157_v42  ;;  %358 = vmatpush2.msra.mxu1 %v159_v43  ;;  %v395_v34 = vld [vmem:[#allocation8 + $0x78] sm:$0xff]  ;;  %v394_v36 = vld [vmem:[#allocation8 + $0x70] sm:$0xff]  ;;  %v393_v38 = vld [vmem:[#allocation8 + $0x68] sm:$0xff] }
  0x6b   :  { %288 = vmatprep.subr.mxu0 %v154_v44  ;;  %359 = vmatprep.subr.mxu1 %v156_v45  ;;  %v459_v35 = vld [vmem:[#allocation8 + $0x278] sm:$0xff]  ;;  %v458_v37 = vld [vmem:[#allocation8 + $0x270] sm:$0xff]  ;;  %v457_v39 = vld [vmem:[#allocation8 + $0x268] sm:$0xff] }
  0x6c   :  { %289 = vmatpush2.msra.mxu0 %v153_v46  ;;  %360 = vmatpush2.msra.mxu1 %v155_v47  ;;  %v392_v40 = vld [vmem:[#allocation8 + $0x60] sm:$0xff]  ;;  %v391_v42 = vld [vmem:[#allocation8 + $0x58] sm:$0xff]  ;;  %v390_v44 = vld [vmem:[#allocation8 + $0x50] sm:$0xff] }
  0x6d   :  { %290 = vmatprep.subr.mxu0 %v150_v48  ;;  %361 = vmatprep.subr.mxu1 %v152_v49  ;;  %v456_v41 = vld [vmem:[#allocation8 + $0x260] sm:$0xff]  ;;  %v455_v43 = vld [vmem:[#allocation8 + $0x258] sm:$0xff]  ;;  %v454_v45 = vld [vmem:[#allocation8 + $0x250] sm:$0xff] }
  0x6e   :  { %291 = vmatpush2.msra.mxu0 %v149_v50  ;;  %362 = vmatpush2.msra.mxu1 %v151_v51  ;;  %v389_v46 = vld [vmem:[#allocation8 + $0x48] sm:$0xff]  ;;  %v388_v48 = vld [vmem:[#allocation8 + $0x40] sm:$0xff]  ;;  %v387_v50 = vld [vmem:[#allocation8 + $0x38] sm:$0xff] }
  0x6f   :  { %292 = vmatprep.subr.mxu0 %v146_v52  ;;  %363 = vmatprep.subr.mxu1 %v148_v53  ;;  %v453_v47 = vld [vmem:[#allocation8 + $0x248] sm:$0xff]  ;;  %v452_v49 = vld [vmem:[#allocation8 + $0x240] sm:$0xff]  ;;  %v451_v51 = vld [vmem:[#allocation8 + $0x238] sm:$0xff] }
  0x70   :  { %293 = vmatpush2.msra.mxu0 %v145_v54  ;;  %364 = vmatpush2.msra.mxu1 %v147_v55  ;;  %v386_v52 = vld [vmem:[#allocation8 + $0x30] sm:$0xff]  ;;  %v385_v54 = vld [vmem:[#allocation8 + $0x28] sm:$0xff] }
  0x71   :  { %294 = vmatprep.subr.mxu0 %v142_v57  ;;  %365 = vmatprep.subr.mxu1 %v144_v58  ;;  %v450_v53 = vld [vmem:[#allocation8 + $0x230] sm:$0xff]  ;;  %v449_v55 = vld [vmem:[#allocation8 + $0x228] sm:$0xff]  ;;  %v448_v57 = vld [vmem:[#allocation8 + $0x220] sm:$0xff] }
  0x72   :  { %295 = vmatpush2.msra.mxu0 %v141_v59  ;;  %366 = vmatpush2.msra.mxu1 %v143_v60  ;;  %v383_v58 = vld [vmem:[#allocation8 + $0x18] sm:$0xff]  ;;  %v382_v60 = vld [vmem:[#allocation8 + $0x10] sm:$0xff] }
  0x73   :  { %296 = vmatprep.subr.mxu0 %v138_v61  ;;  %367 = vmatprep.subr.mxu1 %v140_v62  ;;  %v447_v59 = vld [vmem:[#allocation8 + $0x218] sm:$0xff]  ;;  %v446_v61 = vld [vmem:[#allocation8 + $0x210] sm:$0xff]  ;;  %v381_v62 = vld [vmem:[#allocation8 + $0x8] sm:$0xff] }
  0x74   :  { %297 = vmatpush2.msra.mxu0 %v137_v0  ;;  %298 = vmatprep.mubr.f32.mxu0 %v231_v63  ;;  %v380_v0 = vld [vmem:[#allocation8] sm:$0xff] }
  0x75   :  { %368 = vmatpush2.msra.mxu1 %v139_v1  ;;  %369 = vmatprep.mubr.f32.mxu1 %v231_v63  ;;  %v445_v63 = vld [vmem:[#allocation8 + $0x208] sm:$0xff]  ;;  %v444_v1 = vld [vmem:[#allocation8 + $0x200] sm:$0xff] }
  0x76   :  { %299 = vmatmul.mubr.f32.vlgmr.msra.gmra.mxu0 %v691_v56  ;;  %370 = vmatmul.mubr.f32.vlgmr.msra.gmra.mxu1 %v691_v56  ;;  %v384_v56 = vld [vmem:[#allocation8 + $0x20] sm:$0xff] }
  0x77   :  { %520 = vmatprep.subr.mxu0 %v411_v2  ;;  %591 = vmatprep.subr.mxu1 %v475_v3  ;;  %v443_v2 = vld [vmem:[#allocation8 + $0x1f8] sm:$0xff] }
  0x78   :  { %521 = vmatpush1.msra.mxu0 %v410_v4  ;;  %592 = vmatpush1.msra.mxu1 %v474_v5  ;;  %v507_v3 = vld [vmem:[#allocation8 + $0x3f8] sm:$0xff]  ;;  %v442_v4 = vld [vmem:[#allocation8 + $0x1f0] sm:$0xff] }
  0x79   :  { %522 = vmatprep.subr.mxu0 %v409_v6  ;;  %593 = vmatprep.subr.mxu1 %v473_v7  ;;  %v506_v5 = vld [vmem:[#allocation8 + $0x3f0] sm:$0xff]  ;;  %v441_v6 = vld [vmem:[#allocation8 + $0x1e8] sm:$0xff] }
  0x7a   :  { %523 = vmatpush1.msra.mxu0 %v408_v8  ;;  %594 = vmatpush1.msra.mxu1 %v472_v9  ;;  %v505_v7 = vld [vmem:[#allocation8 + $0x3e8] sm:$0xff]  ;;  %v440_v8 = vld [vmem:[#allocation8 + $0x1e0] sm:$0xff] }
  0x7b   :  { %524 = vmatprep.subr.mxu0 %v407_v10  ;;  %595 = vmatprep.subr.mxu1 %v471_v11  ;;  %v504_v9 = vld [vmem:[#allocation8 + $0x3e0] sm:$0xff]  ;;  %v439_v10 = vld [vmem:[#allocation8 + $0x1d8] sm:$0xff] }
  0x7c   :  { %525 = vmatpush1.msra.mxu0 %v406_v12  ;;  %596 = vmatpush1.msra.mxu1 %v470_v13  ;;  %v503_v11 = vld [vmem:[#allocation8 + $0x3d8] sm:$0xff]  ;;  %v438_v12 = vld [vmem:[#allocation8 + $0x1d0] sm:$0xff] }
  0x7d   :  { %526 = vmatprep.subr.mxu0 %v405_v14  ;;  %597 = vmatprep.subr.mxu1 %v469_v15  ;;  %v502_v13 = vld [vmem:[#allocation8 + $0x3d0] sm:$0xff]  ;;  %v437_v14 = vld [vmem:[#allocation8 + $0x1c8] sm:$0xff] }
  0x7e   :  { %527 = vmatpush1.msra.mxu0 %v404_v16  ;;  %598 = vmatpush1.msra.mxu1 %v468_v17  ;;  %v501_v15 = vld [vmem:[#allocation8 + $0x3c8] sm:$0xff]  ;;  %v436_v16 = vld [vmem:[#allocation8 + $0x1c0] sm:$0xff] }
  0x7f   :  { %528 = vmatprep.subr.mxu0 %v403_v18  ;;  %599 = vmatprep.subr.mxu1 %v467_v19  ;;  %v500_v17 = vld [vmem:[#allocation8 + $0x3c0] sm:$0xff]  ;;  %v435_v18 = vld [vmem:[#allocation8 + $0x1b8] sm:$0xff] }
  0x80   :  { %529 = vmatpush1.msra.mxu0 %v402_v20  ;;  %600 = vmatpush1.msra.mxu1 %v466_v21  ;;  %v499_v19 = vld [vmem:[#allocation8 + $0x3b8] sm:$0xff]  ;;  %v434_v20 = vld [vmem:[#allocation8 + $0x1b0] sm:$0xff] }
  0x81   :  { %530 = vmatprep.subr.mxu0 %v401_v22  ;;  %601 = vmatprep.subr.mxu1 %v465_v23  ;;  %v498_v21 = vld [vmem:[#allocation8 + $0x3b0] sm:$0xff]  ;;  %v433_v22 = vld [vmem:[#allocation8 + $0x1a8] sm:$0xff] }
  0x82   :  { %531 = vmatpush1.msra.mxu0 %v400_v24  ;;  %602 = vmatpush1.msra.mxu1 %v464_v25  ;;  %v497_v23 = vld [vmem:[#allocation8 + $0x3a8] sm:$0xff]  ;;  %v432_v24 = vld [vmem:[#allocation8 + $0x1a0] sm:$0xff] }
  0x83   :  { %532 = vmatprep.subr.mxu0 %v399_v26  ;;  %603 = vmatprep.subr.mxu1 %v463_v27  ;;  %v496_v25 = vld [vmem:[#allocation8 + $0x3a0] sm:$0xff]  ;;  %v431_v26 = vld [vmem:[#allocation8 + $0x198] sm:$0xff] }
  0x84   :  { %533 = vmatpush1.msra.mxu0 %v398_v28  ;;  %604 = vmatpush1.msra.mxu1 %v462_v29  ;;  %v495_v27 = vld [vmem:[#allocation8 + $0x398] sm:$0xff]  ;;  %v430_v28 = vld [vmem:[#allocation8 + $0x190] sm:$0xff] }
  0x85   :  { %534 = vmatprep.subr.mxu0 %v397_v30  ;;  %605 = vmatprep.subr.mxu1 %v461_v31  ;;  %v494_v29 = vld [vmem:[#allocation8 + $0x390] sm:$0xff]  ;;  %v429_v30 = vld [vmem:[#allocation8 + $0x188] sm:$0xff] }
  0x86   :  { %535 = vmatpush1.msra.mxu0 %v396_v32  ;;  %606 = vmatpush1.msra.mxu1 %v460_v33  ;;  %v493_v31 = vld [vmem:[#allocation8 + $0x388] sm:$0xff]  ;;  %v428_v32 = vld [vmem:[#allocation8 + $0x180] sm:$0xff] }
  0x87   :  { %536 = vmatprep.subr.mxu0 %v395_v34  ;;  %607 = vmatprep.subr.mxu1 %v459_v35  ;;  %v492_v33 = vld [vmem:[#allocation8 + $0x380] sm:$0xff]  ;;  %v427_v34 = vld [vmem:[#allocation8 + $0x178] sm:$0xff] }
  0x88   :  { %537 = vmatpush1.msra.mxu0 %v394_v36  ;;  %608 = vmatpush1.msra.mxu1 %v458_v37  ;;  %v491_v35 = vld [vmem:[#allocation8 + $0x378] sm:$0xff]  ;;  %v426_v36 = vld [vmem:[#allocation8 + $0x170] sm:$0xff] }
  0x89   :  { %538 = vmatprep.subr.mxu0 %v393_v38  ;;  %609 = vmatprep.subr.mxu1 %v457_v39  ;;  %v490_v37 = vld [vmem:[#allocation8 + $0x370] sm:$0xff]  ;;  %v425_v38 = vld [vmem:[#allocation8 + $0x168] sm:$0xff] }
  0x8a   :  { %539 = vmatpush1.msra.mxu0 %v392_v40  ;;  %610 = vmatpush1.msra.mxu1 %v456_v41  ;;  %v489_v39 = vld [vmem:[#allocation8 + $0x368] sm:$0xff]  ;;  %v424_v40 = vld [vmem:[#allocation8 + $0x160] sm:$0xff] }
  0x8b   :  { %540 = vmatprep.subr.mxu0 %v391_v42  ;;  %611 = vmatprep.subr.mxu1 %v455_v43  ;;  %v488_v41 = vld [vmem:[#allocation8 + $0x360] sm:$0xff]  ;;  %v423_v42 = vld [vmem:[#allocation8 + $0x158] sm:$0xff] }
  0x8c   :  { %541 = vmatpush1.msra.mxu0 %v390_v44  ;;  %612 = vmatpush1.msra.mxu1 %v454_v45  ;;  %v487_v43 = vld [vmem:[#allocation8 + $0x358] sm:$0xff]  ;;  %v422_v44 = vld [vmem:[#allocation8 + $0x150] sm:$0xff] }
  0x8d   :  { %542 = vmatprep.subr.mxu0 %v389_v46  ;;  %613 = vmatprep.subr.mxu1 %v453_v47  ;;  %v486_v45 = vld [vmem:[#allocation8 + $0x350] sm:$0xff]  ;;  %v421_v46 = vld [vmem:[#allocation8 + $0x148] sm:$0xff] }
  0x8e   :  { %543 = vmatpush1.msra.mxu0 %v388_v48  ;;  %614 = vmatpush1.msra.mxu1 %v452_v49  ;;  %v485_v47 = vld [vmem:[#allocation8 + $0x348] sm:$0xff]  ;;  %v420_v48 = vld [vmem:[#allocation8 + $0x140] sm:$0xff] }
  0x8f   :  { %544 = vmatprep.subr.mxu0 %v387_v50  ;;  %615 = vmatprep.subr.mxu1 %v451_v51  ;;  %v484_v49 = vld [vmem:[#allocation8 + $0x340] sm:$0xff]  ;;  %v419_v50 = vld [vmem:[#allocation8 + $0x138] sm:$0xff] }
  0x90   :  { %545 = vmatpush1.msra.mxu0 %v386_v52  ;;  %616 = vmatpush1.msra.mxu1 %v450_v53  ;;  %v483_v51 = vld [vmem:[#allocation8 + $0x338] sm:$0xff]  ;;  %v418_v52 = vld [vmem:[#allocation8 + $0x130] sm:$0xff] }
  0x91   :  { %546 = vmatprep.subr.mxu0 %v385_v54  ;;  %617 = vmatprep.subr.mxu1 %v449_v55  ;;  %v482_v53 = vld [vmem:[#allocation8 + $0x330] sm:$0xff]  ;;  %v417_v54 = vld [vmem:[#allocation8 + $0x128] sm:$0xff] }
  0x92   :  { %547 = vmatpush1.msra.mxu0 %v384_v56  ;;  %618 = vmatpush1.msra.mxu1 %v448_v57  ;;  %v481_v55 = vld [vmem:[#allocation8 + $0x328] sm:$0xff]  ;;  %v416_v56 = vld [vmem:[#allocation8 + $0x120] sm:$0xff] }
  0x93   :  { %548 = vmatprep.subr.mxu0 %v383_v58  ;;  %619 = vmatprep.subr.mxu1 %v447_v59  ;;  %v480_v57 = vld [vmem:[#allocation8 + $0x320] sm:$0xff]  ;;  %v415_v58 = vld [vmem:[#allocation8 + $0x118] sm:$0xff] }
  0x94   :  { %549 = vmatpush1.msra.mxu0 %v382_v60  ;;  %620 = vmatpush1.msra.mxu1 %v446_v61  ;;  %v479_v59 = vld [vmem:[#allocation8 + $0x318] sm:$0xff]  ;;  %v414_v60 = vld [vmem:[#allocation8 + $0x110] sm:$0xff] }
  0x95   :  { %550 = vmatprep.subr.mxu0 %v381_v62  ;;  %621 = vmatprep.subr.mxu1 %v445_v63  ;;  %v478_v61 = vld [vmem:[#allocation8 + $0x310] sm:$0xff]  ;;  %v413_v62 = vld [vmem:[#allocation8 + $0x108] sm:$0xff] }
  0x96   :  { %551 = vmatpush1.msra.mxu0 %v380_v0  ;;  %622 = vmatpush1.msra.mxu1 %v444_v1  ;;  %v477_v63 = vld [vmem:[#allocation8 + $0x308] sm:$0xff]  ;;  %v412_v0 = vld [vmem:[#allocation8 + $0x100] sm:$0xff] }
  0x97   :  { %552 = vmatprep.subr.mxu0 %v443_v2  ;;  %623 = vmatprep.subr.mxu1 %v507_v3  ;;  %v476_v1 = vld [vmem:[#allocation8 + $0x300] sm:$0xff]  ;;  %v203_v2 = vlaneseq }
  0x98   :  { %553 = vmatpush2.msra.mxu0 %v442_v4  ;;  %624 = vmatpush2.msra.mxu1 %v506_v5 }
  0x99   :  { %554 = vmatprep.subr.mxu0 %v441_v6  ;;  %625 = vmatprep.subr.mxu1 %v505_v7  ;;  %v204_v3 = vshrl.u32 %v203_v2, 7  ;;  %v201_v6 = vld [vmem:[#allocation7] sm:$0xf] }
  0x9a   :  { %555 = vmatpush2.msra.mxu0 %v440_v8  ;;  %626 = vmatpush2.msra.mxu1 %v504_v9 }
  0x9b   :  { %556 = vmatprep.subr.mxu0 %v439_v10  ;;  %627 = vmatprep.subr.mxu1 %v503_v11  ;;  %v213_v4 = vsub.s32 2, %v204_v3  ;;  %v205_v5 = vsub.s32 0, %v204_v3  ;;  %v209_v7 = vsub.s32 1, %v204_v3  ;;  %v217_v8 = vsub.s32 3, %v204_v3 }
  0x9c   :  { %557 = vmatpush2.msra.mxu0 %v438_v12  ;;  %628 = vmatpush2.msra.mxu1 %v502_v13 }
  0x9d   :  { %558 = vmatprep.subr.mxu0 %v437_v14  ;;  %629 = vmatprep.subr.mxu1 %v501_v15  ;;  %v214_v9 = vrot.slane %v201_v6, %v213_v4  ;;  %v206_v10 = vrot.slane %v201_v6, %v205_v5  ;;  %v210_v11 = vrot.slane %v201_v6, %v209_v7 }
  0x9e   :  { %559 = vmatpush2.msra.mxu0 %v436_v16  ;;  %630 = vmatpush2.msra.mxu1 %v500_v17  ;;  %v218_v12 = vrot.slane %v201_v6, %v217_v8 }
  0x9f   :  { %560 = vmatprep.subr.mxu0 %v435_v18  ;;  %631 = vmatprep.subr.mxu1 %v499_v19 }
  0xa0   :  { %561 = vmatpush2.msra.mxu0 %v434_v20  ;;  %632 = vmatpush2.msra.mxu1 %v498_v21 }
  0xa1   :  { %562 = vmatprep.subr.mxu0 %v433_v22  ;;  %633 = vmatprep.subr.mxu1 %v497_v23 }
  0xa2   :  { %563 = vmatpush2.msra.mxu0 %v432_v24  ;;  %634 = vmatpush2.msra.mxu1 %v496_v25  ;;  %v508_v25 = vld [vmem:[%s871_s4] sm:$0x3] }
  0xa3   :  { %564 = vmatprep.subr.mxu0 %v431_v26  ;;  %635 = vmatprep.subr.mxu1 %v495_v27  ;;  %v513_v26 = vrot.slane %v508_v25, %v205_v5  ;;  %v517_v27 = vrot.slane %v508_v25, %v209_v7 }
  0xa4   :  { %565 = vmatpush2.msra.mxu0 %v430_v28  ;;  %636 = vmatpush2.msra.mxu1 %v494_v29 }
  0xa5   :  { %566 = vmatprep.subr.mxu0 %v429_v30  ;;  %637 = vmatprep.subr.mxu1 %v493_v31 }
  0xa6   :  { %567 = vmatpush2.msra.mxu0 %v428_v32  ;;  %638 = vmatpush2.msra.mxu1 %v492_v33 }
  0xa7   :  { %568 = vmatprep.subr.mxu0 %v427_v34  ;;  %639 = vmatprep.subr.mxu1 %v491_v35 }
  0xa8   :  { %569 = vmatpush2.msra.mxu0 %v426_v36  ;;  %640 = vmatpush2.msra.mxu1 %v490_v37 }
  0xa9   :  { %570 = vmatprep.subr.mxu0 %v425_v38  ;;  %641 = vmatprep.subr.mxu1 %v489_v39 }
  0xaa   :  { %571 = vmatpush2.msra.mxu0 %v424_v40  ;;  %642 = vmatpush2.msra.mxu1 %v488_v41 }
  0xab   :  { %572 = vmatprep.subr.mxu0 %v423_v42  ;;  %643 = vmatprep.subr.mxu1 %v487_v43 }
  0xac   :  { %573 = vmatpush2.msra.mxu0 %v422_v44  ;;  %644 = vmatpush2.msra.mxu1 %v486_v45 }
  0xad   :  { %574 = vmatprep.subr.mxu0 %v421_v46  ;;  %645 = vmatprep.subr.mxu1 %v485_v47 }
  0xae   :  { %575 = vmatpush2.msra.mxu0 %v420_v48  ;;  %646 = vmatpush2.msra.mxu1 %v484_v49 }
  0xaf   :  { %576 = vmatprep.subr.mxu0 %v419_v50  ;;  %647 = vmatprep.subr.mxu1 %v483_v51 }
  0xb0   :  { %577 = vmatpush2.msra.mxu0 %v418_v52  ;;  %648 = vmatpush2.msra.mxu1 %v482_v53 }
  0xb1   :  { %578 = vmatprep.subr.mxu0 %v417_v54  ;;  %649 = vmatprep.subr.mxu1 %v481_v55 }
  0xb2   :  { %579 = vmatpush2.msra.mxu0 %v416_v56  ;;  %650 = vmatpush2.msra.mxu1 %v480_v57 }
  0xb3   :  { %580 = vmatprep.subr.mxu0 %v415_v58  ;;  %651 = vmatprep.subr.mxu1 %v479_v59 }
  0xb4   :  { %581 = vmatpush2.msra.mxu0 %v414_v60  ;;  %652 = vmatpush2.msra.mxu1 %v478_v61 }
  0xb5   :  { %582 = vmatprep.subr.mxu0 %v413_v62  ;;  %653 = vmatprep.subr.mxu1 %v477_v63 }
  0xb6   :  { %583 = vmatpush2.msra.mxu0 %v412_v0  ;;  %654 = vmatpush2.msra.mxu1 %v476_v1 }
 0x136   :  { %v300_v13 = vpop.f32.mrf.mxu0  ;;  %v371_v14 = vpop.f32.mrf.mxu1 }
 0x137   :  { %v372_v15 = vadd.f32 %v371_v14, %v214_v9  ;;  %v301_v16 = vadd.f32 %v300_v13, %v206_v10 }
 0x138   :  { %v302_v17 = vpop.f32.mrf.mxu0  ;;  %v373_v18 = vpop.f32.mrf.mxu1 }
 0x139   :  { %v303_v19 = vadd.f32 %v302_v17, %v210_v11  ;;  %v374_v20 = vadd.f32 %v373_v18, %v218_v12  ;;  %v378_v21 = vmax.f32 %v372_v15, 0.0  ;;  %v376_v24 = vmax.f32 %v301_v16, 0.0 }
 0x13b   :  { %v377_v22 = vmax.f32 %v303_v19, 0.0  ;;  %v379_v23 = vmax.f32 %v374_v20, 0.0 }
 0x13d   :  { %584 = vmatprep.mubr.f32.mxu0 %v377_v22  ;;  %655 = vmatprep.mubr.f32.mxu1 %v379_v23 }
 0x13e   :  { %585 = vmatmul.mubr.f32.vlgmr.msra.gmra.mxu0 %v376_v24  ;;  %656 = vmatmul.mubr.f32.vlgmr.msra.gmra.mxu1 %v378_v21 }
 0x1fe   :  { %v586_v28 = vpop.f32.mrf.mxu0  ;;  %v657_v29 = vpop.f32.mrf.mxu1 }
 0x1ff   :  { %v587_v30 = vadd.f32 %v586_v28, %v513_v26 }
 0x200   :  { %v588_v31 = vpop.f32.mrf.mxu0  ;;  %v659_v33 = vpop.f32.mrf.mxu1 }
 0x201   :  { %v589_v32 = vadd.f32 %v588_v31, %v517_v27  ;;  %v658_v34 = vadd.f32 %v657_v29, %v587_v30 }
 0x203   :  { %v660_v35 = vadd.f32 %v659_v33, %v589_v32 }
 0x205   :  { %v664_v36 = vcombine.low %v658_v34, %v660_v35 }
 0x207   :  { %692 = vst.sshfl [vmem:[#allocation10] sm:$0x33 pattern:$0x76325410] %v664_v36 }
 0x208   :  { %793 = shalt.err (!%p790_p10)
}
 0x209   :  { %683 = dma.vmem_to_hbm [thread:$0]  %s681_s16, 64, %s872_s5, [#allocation4]  }
 0x20a   :  { %808 = dma.done.wait [#allocation4], 64  }
 0x20b   :  { %809 = vsyncadd [#allocation4], 4294967232 }
 0x20c   :  { %687 = vsyncpa [#allocation3], 1 }
 0x20d   :  { %688 = vsyncpa [#allocation6], 1 }
 0x20e   :  { %689 = vsyncpa [#allocation9], 1 }
 0x20f   :  { %690 = vsyncpa [#allocation4], 1 }

</bundles_post_ra>
